<compile_context>
chip_gen: v7x
topology: tpu7x:2x2x1
jax: 0.10.0
libtpu: 0.0.40
codegen_flags: <defaults>
</compile_context>

<pallas_src>
import jax
import jax.numpy as jnp
from jax.experimental import pallas as pl
from jax.experimental.pallas import tpu as pltpu


def _round_up(a, m):
    return ((a + m - 1) // m) * m


def _mlp_kernel(x_ref, w1_ref, b1_ref, w2_ref, b2_ref,
                w3_ref, b3_ref, w4_ref, b4_ref, o_ref):
    # Fused 4x (matmul + bias [+ relu]). Matmul inputs bf16, accumulate f32,
    # elementwise (bias + ReLU) in f32, recast to bf16 only at the dot inputs.
    h = jnp.dot(x_ref[...], w1_ref[...], preferred_element_type=jnp.float32)
    h = jnp.maximum(h + b1_ref[...], 0.0)

    h = jnp.dot(h.astype(jnp.bfloat16), w2_ref[...],
                preferred_element_type=jnp.float32)
    h = jnp.maximum(h + b2_ref[...], 0.0)

    h = jnp.dot(h.astype(jnp.bfloat16), w3_ref[...],
                preferred_element_type=jnp.float32)
    h = jnp.maximum(h + b3_ref[...], 0.0)

    out = jnp.dot(h.astype(jnp.bfloat16), w4_ref[...],
                  preferred_element_type=jnp.float32) + b4_ref[...]
    o_ref[...] = out.astype(o_ref.dtype)


def players_ball_encoding(x, params, *, tile_m=512):
    """x: [..., input_dim] float32.  params: w1..w4 ([in,out]) and b1..b4 ([1,out])."""
    w1, b1 = params["w1"], params["b1"]
    w2, b2 = params["w2"], params["b2"]
    w3, b3 = params["w3"], params["b3"]
    w4, b4 = params["w4"], params["b4"]

    lead_shape = x.shape[:-1]
    input_dim = x.shape[-1]
    output_dim = w4.shape[1]
    h1, h2, h3 = w1.shape[1], w2.shape[1], w3.shape[1]

    # Flatten all leading dims (batch, entities, ...) into rows.
    x2 = x.reshape(-1, input_dim)
    n = x2.shape[0]

    # ---- lane / row padding (all pads are zeros, sliced off afterwards) ----
    in_pad = _round_up(input_dim, 128)
    out_pad = _round_up(output_dim, 128)
    tile_m = min(tile_m, _round_up(n, 8))        # don't over-pad tiny inputs
    n_pad = _round_up(n, tile_m)

    x_p = x2
    if n_pad != n or in_pad != input_dim:
        x_p = jnp.pad(x2, ((0, n_pad - n), (0, in_pad - input_dim)))
    w1_p = jnp.pad(w1, ((0, in_pad - input_dim), (0, 0)))
    w4_p = jnp.pad(w4, ((0, 0), (0, out_pad - output_dim)))
    b4_p = jnp.pad(b4, ((0, 0), (0, out_pad - output_dim)))

    # bf16 matmul operands (f32 accumulation inside the kernel).
    x_bf = x_p.astype(jnp.bfloat16)
    w1_bf = w1_p.astype(jnp.bfloat16)
    w2_bf = w2.astype(jnp.bfloat16)
    w3_bf = w3.astype(jnp.bfloat16)
    w4_bf = w4_p.astype(jnp.bfloat16)
    b1_f = b1.astype(jnp.float32)
    b2_f = b2.astype(jnp.float32)
    b3_f = b3.astype(jnp.float32)
    b4_f = b4_p.astype(jnp.float32)

    grid = (n_pad // tile_m,)

    # Weights / biases: constant block index -> stay resident across the grid.
    def full(a):
        return pl.BlockSpec(a.shape, lambda i: (0, 0))

    flops = 2 * n_pad * (in_pad * h1 + h1 * h2 + h2 * h3 + h3 * out_pad)
    bytes_accessed = (
        x_bf.size * 2 + w1_bf.size * 2 + w2_bf.size * 2 + w3_bf.size * 2
        + w4_bf.size * 2 + (b1_f.size + b2_f.size + b3_f.size + b4_f.size) * 4
        + n_pad * out_pad * 4)

    out = pl.pallas_call(
        _mlp_kernel,
        out_shape=jax.ShapeDtypeStruct((n_pad, out_pad), jnp.float32),
        grid_spec=pltpu.PrefetchScalarGridSpec(
            num_scalar_prefetch=0,
            grid=grid,
            in_specs=[
                pl.BlockSpec((tile_m, in_pad), lambda i: (i, 0)),  # x row tile
                full(w1_bf), full(b1_f),
                full(w2_bf), full(b2_f),
                full(w3_bf), full(b3_f),
                full(w4_bf), full(b4_f),
            ],
            out_specs=pl.BlockSpec((tile_m, out_pad), lambda i: (i, 0)),
        ),
        compiler_params=pltpu.CompilerParams(
            dimension_semantics=("parallel",)),
        cost_estimate=pl.CostEstimate(
            flops=flops, transcendentals=0, bytes_accessed=bytes_accessed),
    )(x_bf, w1_bf, b1_f, w2_bf, b2_f, w3_bf, b3_f, w4_bf, b4_f)

    out = out[:n, :output_dim]
    return out.reshape(*lead_shape, output_dim)


def init_params(key, input_dim, output_dim):
    """Deterministic init mirroring nn.Linear's U(-1/sqrt(in), 1/sqrt(in))."""
    dims = [(input_dim, 128), (128, 256), (256, 512), (512, output_dim)]
    params = {}
    keys = jax.random.split(key, 2 * len(dims))
    for idx, (fan_in, fan_out) in enumerate(dims):
        bound = 1.0 / (fan_in ** 0.5)
        params[f"w{idx + 1}"] = jax.random.uniform(
            keys[2 * idx], (fan_in, fan_out), jnp.float32, -bound, bound)
        params[f"b{idx + 1}"] = jax.random.uniform(
            keys[2 * idx + 1], (1, fan_out), jnp.float32, -bound, bound)
    return params


def reference_mlp(x, params):
    h = jnp.maximum(x @ params["w1"] + params["b1"], 0.0)
    h = jnp.maximum(h @ params["w2"] + params["b2"], 0.0)
    h = jnp.maximum(h @ params["w3"] + params["b3"], 0.0)
    return h @ params["w4"] + params["b4"]


if __name__ == "__main__":
    key = jax.random.PRNGKey(0)
    k_x, k_p = jax.random.split(key)

    batch, entities, input_dim, output_dim = 2, 8, 32, 64
    # Players + ball as entities: [batch, entities, input_dim]
    x = jax.random.normal(k_x, (batch, entities, input_dim), jnp.float32)
    params = init_params(k_p, input_dim, output_dim)

    out = players_ball_encoding(x, params)
    out = jax.block_until_ready(out)

    ref = reference_mlp(x, params)
    assert out.shape == (batch, entities, output_dim), out.shape
    # bf16 matmul inputs with f32 accumulation -> check relative error.
    rel_err = jnp.max(jnp.abs(out - ref)) / (jnp.max(jnp.abs(ref)) + 1e-6)
    assert rel_err < 2e-2, f"mismatch vs reference, rel_err={rel_err}"
    print("KERNEL_OK")
</pallas_src>

<mosaic_0001>
module attributes {stable_mosaic.version = 11 : i64} {
  func.func @_mlp_kernel(%arg0: i32, %arg1: memref<16x128xbf16, #tpu.memory_space<vmem>>, %arg2: memref<128x128xbf16, #tpu.memory_space<vmem>>, %arg3: memref<1x128xf32, #tpu.memory_space<vmem>>, %arg4: memref<128x256xbf16, #tpu.memory_space<vmem>>, %arg5: memref<1x256xf32, #tpu.memory_space<vmem>>, %arg6: memref<256x512xbf16, #tpu.memory_space<vmem>>, %arg7: memref<1x512xf32, #tpu.memory_space<vmem>>, %arg8: memref<512x128xbf16, #tpu.memory_space<vmem>>, %arg9: memref<1x128xf32, #tpu.memory_space<vmem>>, %arg10: memref<16x128xf32, #tpu.memory_space<vmem>>) attributes {dimension_semantics = [#tpu.dimension_semantics<parallel>], iteration_bounds = array<i64: 1>, scalar_prefetch = 0 : i64, scratch_operands = 0 : i64, tpu.core_type = #tpu.core_type<tc>, window_params = [{transform_indices = @transform_0, window_bounds = array<i64: 16, 128>}, {pipeline_mode = #tpu.pipeline_mode<synchronous>, transform_indices = @transform_1, window_bounds = array<i64: 128, 128>}, {pipeline_mode = #tpu.pipeline_mode<synchronous>, transform_indices = @transform_2, window_bounds = array<i64: 1, 128>}, {pipeline_mode = #tpu.pipeline_mode<synchronous>, transform_indices = @transform_3, window_bounds = array<i64: 128, 256>}, {pipeline_mode = #tpu.pipeline_mode<synchronous>, transform_indices = @transform_4, window_bounds = array<i64: 1, 256>}, {pipeline_mode = #tpu.pipeline_mode<synchronous>, transform_indices = @transform_5, window_bounds = array<i64: 256, 512>}, {pipeline_mode = #tpu.pipeline_mode<synchronous>, transform_indices = @transform_6, window_bounds = array<i64: 1, 512>}, {pipeline_mode = #tpu.pipeline_mode<synchronous>, transform_indices = @transform_7, window_bounds = array<i64: 512, 128>}, {pipeline_mode = #tpu.pipeline_mode<synchronous>, transform_indices = @transform_8, window_bounds = array<i64: 1, 128>}, {transform_indices = @transform_9, window_bounds = array<i64: 16, 128>}]} {
    %c0 = arith.constant 0 : index
    %c0_0 = arith.constant 0 : index
    %0 = vector.load %arg1[%c0, %c0_0] : memref<16x128xbf16, #tpu.memory_space<vmem>>, vector<16x128xbf16>
    %c0_1 = arith.constant 0 : index
    %c0_2 = arith.constant 0 : index
    %1 = vector.load %arg2[%c0_1, %c0_2] : memref<128x128xbf16, #tpu.memory_space<vmem>>, vector<128x128xbf16>
    %cst = arith.constant dense<0.000000e+00> : vector<16x128xf32>
    %2 = tpu.matmul %0, %1, %cst {dimension_numbers = #tpu.dot_dimension_numbers<[1], [0], [0], [1], [0, 0, 1, 1], [], []>} : vector<16x128xbf16>, vector<128x128xbf16>, vector<16x128xf32> -> vector<16x128xf32>
    %c0_3 = arith.constant 0 : index
    %c0_4 = arith.constant 0 : index
    %3 = vector.load %arg3[%c0_3, %c0_4] : memref<1x128xf32, #tpu.memory_space<vmem>>, vector<1x128xf32>
    %4 = vector.broadcast %3 : vector<1x128xf32> to vector<16x128xf32>
    %5 = arith.addf %2, %4 : vector<16x128xf32>
    %cst_5 = arith.constant 0.000000e+00 : f32
    %6 = vector.broadcast %cst_5 : f32 to vector<16x128xf32>
    %7 = arith.maximumf %5, %6 : vector<16x128xf32>
    %8 = arith.truncf %7 : vector<16x128xf32> to vector<16x128xbf16>
    %c0_6 = arith.constant 0 : index
    %c0_7 = arith.constant 0 : index
    %9 = vector.load %arg4[%c0_6, %c0_7] : memref<128x256xbf16, #tpu.memory_space<vmem>>, vector<128x256xbf16>
    %cst_8 = arith.constant dense<0.000000e+00> : vector<16x256xf32>
    %10 = tpu.matmul %8, %9, %cst_8 {dimension_numbers = #tpu.dot_dimension_numbers<[1], [0], [0], [1], [0, 0, 1, 1], [], []>} : vector<16x128xbf16>, vector<128x256xbf16>, vector<16x256xf32> -> vector<16x256xf32>
    %c0_9 = arith.constant 0 : index
    %c0_10 = arith.constant 0 : index
    %11 = vector.load %arg5[%c0_9, %c0_10] : memref<1x256xf32, #tpu.memory_space<vmem>>, vector<1x256xf32>
    %12 = vector.broadcast %11 : vector<1x256xf32> to vector<16x256xf32>
    %13 = arith.addf %10, %12 : vector<16x256xf32>
    %cst_11 = arith.constant 0.000000e+00 : f32
    %14 = vector.broadcast %cst_11 : f32 to vector<16x256xf32>
    %15 = arith.maximumf %13, %14 : vector<16x256xf32>
    %16 = arith.truncf %15 : vector<16x256xf32> to vector<16x256xbf16>
    %c0_12 = arith.constant 0 : index
    %c0_13 = arith.constant 0 : index
    %17 = vector.load %arg6[%c0_12, %c0_13] : memref<256x512xbf16, #tpu.memory_space<vmem>>, vector<256x512xbf16>
    %cst_14 = arith.constant dense<0.000000e+00> : vector<16x512xf32>
    %18 = tpu.matmul %16, %17, %cst_14 {dimension_numbers = #tpu.dot_dimension_numbers<[1], [0], [0], [1], [0, 0, 1, 1], [], []>} : vector<16x256xbf16>, vector<256x512xbf16>, vector<16x512xf32> -> vector<16x512xf32>
    %c0_15 = arith.constant 0 : index
    %c0_16 = arith.constant 0 : index
    %19 = vector.load %arg7[%c0_15, %c0_16] : memref<1x512xf32, #tpu.memory_space<vmem>>, vector<1x512xf32>
    %20 = vector.broadcast %19 : vector<1x512xf32> to vector<16x512xf32>
    %21 = arith.addf %18, %20 : vector<16x512xf32>
    %cst_17 = arith.constant 0.000000e+00 : f32
    %22 = vector.broadcast %cst_17 : f32 to vector<16x512xf32>
    %23 = arith.maximumf %21, %22 : vector<16x512xf32>
    %24 = arith.truncf %23 : vector<16x512xf32> to vector<16x512xbf16>
    %c0_18 = arith.constant 0 : index
    %c0_19 = arith.constant 0 : index
    %25 = vector.load %arg8[%c0_18, %c0_19] : memref<512x128xbf16, #tpu.memory_space<vmem>>, vector<512x128xbf16>
    %cst_20 = arith.constant dense<0.000000e+00> : vector<16x128xf32>
    %26 = tpu.matmul %24, %25, %cst_20 {dimension_numbers = #tpu.dot_dimension_numbers<[1], [0], [0], [1], [0, 0, 1, 1], [], []>} : vector<16x512xbf16>, vector<512x128xbf16>, vector<16x128xf32> -> vector<16x128xf32>
    %c0_21 = arith.constant 0 : index
    %c0_22 = arith.constant 0 : index
    %27 = vector.load %arg9[%c0_21, %c0_22] : memref<1x128xf32, #tpu.memory_space<vmem>>, vector<1x128xf32>
    %28 = vector.broadcast %27 : vector<1x128xf32> to vector<16x128xf32>
    %29 = arith.addf %26, %28 : vector<16x128xf32>
    %c0_23 = arith.constant 0 : index
    %c0_24 = arith.constant 0 : index
    %30 = vector.load %arg10[%c0_23, %c0_24] : memref<16x128xf32, #tpu.memory_space<vmem>>, vector<16x128xf32>
    tpu.vector_store %arg10[%c0_23, %c0_24], %29 {strides = array<i32>} : memref<16x128xf32, #tpu.memory_space<vmem>>, vector<16x128xf32>,
    return
  }
  func.func @transform_0(%arg0: i32) -> (i32, i32) {
    %c0_i32 = arith.constant 0 : i32
    %c0_i32_0 = arith.constant 0 : i32
    return %arg0, %c0_i32 : i32, i32
  }
  func.func @transform_1(%arg0: i32) -> (i32, i32) {
    %c0_i32 = arith.constant 0 : i32
    %c0_i32_0 = arith.constant 0 : i32
    %c0_i32_1 = arith.constant 0 : i32
    return %c0_i32, %c0_i32_0 : i32, i32
  }
  func.func @transform_2(%arg0: i32) -> (i32, i32) {
    %c0_i32 = arith.constant 0 : i32
    %c0_i32_0 = arith.constant 0 : i32
    %c0_i32_1 = arith.constant 0 : i32
    return %c0_i32, %c0_i32_0 : i32, i32
  }
  func.func @transform_3(%arg0: i32) -> (i32, i32) {
    %c0_i32 = arith.constant 0 : i32
    %c0_i32_0 = arith.constant 0 : i32
    %c0_i32_1 = arith.constant 0 : i32
    return %c0_i32, %c0_i32_0 : i32, i32
  }
  func.func @transform_4(%arg0: i32) -> (i32, i32) {
    %c0_i32 = arith.constant 0 : i32
    %c0_i32_0 = arith.constant 0 : i32
    %c0_i32_1 = arith.constant 0 : i32
    return %c0_i32, %c0_i32_0 : i32, i32
  }
  func.func @transform_5(%arg0: i32) -> (i32, i32) {
    %c0_i32 = arith.constant 0 : i32
    %c0_i32_0 = arith.constant 0 : i32
    %c0_i32_1 = arith.constant 0 : i32
    return %c0_i32, %c0_i32_0 : i32, i32
  }
  func.func @transform_6(%arg0: i32) -> (i32, i32) {
    %c0_i32 = arith.constant 0 : i32
    %c0_i32_0 = arith.constant 0 : i32
    %c0_i32_1 = arith.constant 0 : i32
    return %c0_i32, %c0_i32_0 : i32, i32
  }
  func.func @transform_7(%arg0: i32) -> (i32, i32) {
    %c0_i32 = arith.constant 0 : i32
    %c0_i32_0 = arith.constant 0 : i32
    %c0_i32_1 = arith.constant 0 : i32
    return %c0_i32, %c0_i32_0 : i32, i32
  }
  func.func @transform_8(%arg0: i32) -> (i32, i32) {
    %c0_i32 = arith.constant 0 : i32
    %c0_i32_0 = arith.constant 0 : i32
    %c0_i32_1 = arith.constant 0 : i32
    return %c0_i32, %c0_i32_0 : i32, i32
  }
  func.func @transform_9(%arg0: i32) -> (i32, i32) {
    %c0_i32 = arith.constant 0 : i32
    %c0_i32_0 = arith.constant 0 : i32
    return %arg0, %c0_i32 : i32, i32
  }
}

</mosaic_0001>

<bundles_post_ra>
// kernel: tpu_custom_call.1
= control target key start
LH: loop header
LB: loop body
LE: loop exit
PB: predicated region body
PF: predicated region fallthrough
CT: control target
= control target key end

     0   :  { %14 = vsyncpa [#allocation3], 0  ;;  %s1956_s0 = inlined_call_operand.hbm [shape: bf16[16,128], index: 0, kind: input, shape index: {}]   ;;  %s1957_s1 = inlined_call_operand.hbm [shape: bf16[128,128], index: 1, kind: input, shape index: {}]   ;;  %s1958_s2 = inlined_call_operand.vmem [shape: f32[1,128], index: 2, kind: input, shape index: {}]   ;;  %s1959_s3 = inlined_call_operand.hbm [shape: bf16[128,256], index: 3, kind: input, shape index: {}]   ;;  %s1960_s4 = inlined_call_operand.vmem [shape: f32[1,256], index: 4, kind: input, shape index: {}]   ;;  %s1961_s5 = inlined_call_operand.hbm [shape: bf16[256,512], index: 5, kind: input, shape index: {}]   ;;  %s1962_s6 = inlined_call_operand.vmem [shape: f32[1,512], index: 6, kind: input, shape index: {}]   ;;  %s1963_s7 = inlined_call_operand.hbm [shape: bf16[512,128], index: 7, kind: input, shape index: {}]   ;;  %s1964_s8 = inlined_call_operand.vmem [shape: f32[1,128], index: 8, kind: input, shape index: {}]   ;;  %s1965_s9 = inlined_call_operand.hbm [shape: f32[16,128], index: 9, kind: output, shape index: {}]  }
   0x1   :  { %15 = vsyncpa [#allocation6], 0 }
   0x2   :  { %16 = vsyncpa [#allocation9], 0 }
   0x3   :  { %17 = vsyncpa [#allocation4], 0  ;;  %s1764_s30 = smov [#allocation5]   ;;  %s1765_s11 = smov [#allocation8]  }
   0x4   :  { %s35_s10 = sshll.u32 %s1764_s30, 4  ;;  %s63_s12 = sshll.u32 %s1765_s11, 4  ;;  %s36_s10 = int_to_ptr.vmem [resolvable:$true] %s35_s10  ;;  %s1829_s12 = int_to_ptr.vmem [resolvable:$true] %s63_s12 }
   0x5   :  { %s1624_s15 = scalar_lea.hbm %s1957_s1, 1024 }
   0x6   :  { %p1625_p0 = scmp.ne.s32.totalorder %s1957_s1, %s1624_s15  ;;  %p1628_p1 = scmp.lt.u32.totalorder %s1624_s15, %s1957_s1 }
   0x8   :  { %p1630_p2 = pnand %p1628_p1, %p1625_p0 }
   0xa   :  { %1633 = shalt.err (!%p1630_p2)
}
   0xb   :  { %s1634_s20 = scalar_lea.vmem %s36_s10, 1024  ;;  %p1639_p4 = scmp.lt.s32.totalorder %s36_s10, %s36_s10 }
   0xc   :  { %p1635_p3 = scmp.ne.s32.totalorder %s36_s10, %s1634_s20  ;;  %p1640_p5 = scmp.lt.s32.totalorder %s1634_s20, %s1634_s20 }
   0xe   :  { %p1641_p6 = por %p1640_p5, %p1639_p4 }
  0x10   :  { %p1642_p7 = pnand %p1641_p6, %p1635_p3 }
  0x12   :  { %1645 = shalt.err (!%p1642_p7)
}
  0x13   :  { %s1766_s21 = smov 64   ;;  %s1767_s22 = smov 4  }
  0x14   :  { %41 = dma.hbm_to_vmem [thread:$0]  %s1957_s1, 1024, %s36_s10, [#allocation6], %s1766_s21, %s1766_s21, %s1767_s22  }
  0x15   :  { %s1646_s27 = scalar_lea.hbm %s1961_s5, 8192 }
  0x16   :  { %p1647_p8 = scmp.ne.s32.totalorder %s1961_s5, %s1646_s27  ;;  %p1650_p9 = scmp.lt.u32.totalorder %s1646_s27, %s1961_s5 }
  0x18   :  { %p1652_p10 = pnand %p1650_p9, %p1647_p8 }
  0x1a   :  { %1655 = shalt.err (!%p1652_p10)
}
  0x1b   :  { %s1656_s13 = scalar_lea.vmem %s1829_s12, 8192  ;;  %p1661_p12 = scmp.lt.s32.totalorder %s1829_s12, %s1829_s12 }
  0x1c   :  { %p1657_p11 = scmp.ne.s32.totalorder %s1829_s12, %s1656_s13  ;;  %p1662_p13 = scmp.lt.s32.totalorder %s1656_s13, %s1656_s13 }
  0x1e   :  { %p1663_p0 = por %p1662_p13, %p1661_p12 }
  0x20   :  { %p1664_p1 = pnand %p1663_p0, %p1657_p11 }
  0x22   :  { %1667 = shalt.err (!%p1664_p1)
}
  0x23   :  { %s1768_s1 = smov 256   ;;  %s1769_s10 = smov 16  }
  0x24   :  { %69 = dma.hbm_to_vmem [thread:$0]  %s1961_s5, 8192, %s1829_s12, [#allocation9], %s1768_s1, %s1768_s1, %s1769_s10  }
  0x25   :  { %s1770_s16 = smov [#allocation2]   ;;  %s1771_s18 = smov [#allocation7]  }
  0x26   :  { %s23_s17 = sshll.u32 %s1770_s16, 4  ;;  %s49_s19 = sshll.u32 %s1771_s18, 4  ;;  %s24_s17 = int_to_ptr.vmem [resolvable:$true] %s23_s17  ;;  %s1863_s19 = int_to_ptr.vmem [resolvable:$true] %s49_s19 }
  0x27   :  { %s1668_s24 = scalar_lea.hbm %s1956_s0, 128 }
  0x28   :  { %p1669_p2 = scmp.ne.s32.totalorder %s1956_s0, %s1668_s24  ;;  %p1672_p3 = scmp.lt.u32.totalorder %s1668_s24, %s1956_s0 }
  0x2a   :  { %p1674_p4 = pnand %p1672_p3, %p1669_p2 }
  0x2c   :  { %1677 = shalt.err (!%p1674_p4)
}
  0x2d   :  { %s1678_s5 = scalar_lea.vmem %s24_s17, 128  ;;  %p1683_p6 = scmp.lt.s32.totalorder %s24_s17, %s24_s17 }
  0x2e   :  { %p1679_p5 = scmp.ne.s32.totalorder %s24_s17, %s1678_s5  ;;  %p1684_p7 = scmp.lt.s32.totalorder %s1678_s5, %s1678_s5 }
  0x30   :  { %p1685_p8 = por %p1684_p7, %p1683_p6 }
  0x32   :  { %p1686_p9 = pnand %p1685_p8, %p1679_p5 }
  0x34   :  { %1689 = shalt.err (!%p1686_p9)
}
  0x35   :  { %29 = dma.hbm_to_vmem [thread:$0]  %s1956_s0, 128, %s24_s17, [#allocation3], %s1766_s21, %s1766_s21, %s1767_s22  }
  0x36   :  { %s1690_s13 = scalar_lea.hbm %s1959_s3, 2048 }
  0x37   :  { %p1691_p10 = scmp.ne.s32.totalorder %s1959_s3, %s1690_s13  ;;  %p1694_p11 = scmp.lt.u32.totalorder %s1690_s13, %s1959_s3 }
  0x39   :  { %p1696_p12 = pnand %p1694_p11, %p1691_p10 }
  0x3b   :  { %1699 = shalt.err (!%p1696_p12)
}
  0x3c   :  { %s1700_s16 = scalar_lea.vmem %s1863_s19, 2048  ;;  %p1705_p0 = scmp.lt.s32.totalorder %s1863_s19, %s1863_s19 }
  0x3d   :  { %p1701_p13 = scmp.ne.s32.totalorder %s1863_s19, %s1700_s16  ;;  %p1706_p1 = scmp.lt.s32.totalorder %s1700_s16, %s1700_s16 }
  0x3f   :  { %p1707_p2 = por %p1706_p1, %p1705_p0 }
  0x41   :  { %p1708_p3 = pnand %p1707_p2, %p1701_p13 }
  0x43   :  { %1711 = shalt.err (!%p1708_p3)
}
  0x44   :  { %s1772_s0 = smov 128   ;;  %s1773_s17 = smov 8  }
  0x45   :  { %55 = dma.hbm_to_vmem [thread:$0]  %s1959_s3, 2048, %s1863_s19, [#allocation6], %s1772_s0, %s1772_s0, %s1773_s17  }
  0x46   :  { %s1774_s23 = smov [#allocation10]   ;;  %s1712_s27 = scalar_lea.hbm %s1963_s7, 4096 }
  0x47   :  { %s77_s24 = sshll.u32 %s1774_s23, 4  ;;  %p1713_p4 = scmp.ne.s32.totalorder %s1963_s7, %s1712_s27  ;;  %s78_s24 = int_to_ptr.vmem [resolvable:$true] %s77_s24 }
  0x48   :  { %p1716_p5 = scmp.lt.u32.totalorder %s1712_s27, %s1963_s7 }
  0x4a   :  { %p1718_p6 = pnand %p1716_p5, %p1713_p4 }
  0x4c   :  { %1721 = shalt.err (!%p1718_p6)
}
  0x4d   :  { %s1722_s30 = scalar_lea.vmem %s78_s24, 4096  ;;  %p1727_p8 = scmp.lt.s32.totalorder %s78_s24, %s78_s24 }
  0x4e   :  { %p1723_p7 = scmp.ne.s32.totalorder %s78_s24, %s1722_s30  ;;  %p1728_p9 = scmp.lt.s32.totalorder %s1722_s30, %s1722_s30 }
  0x50   :  { %p1729_p10 = por %p1728_p9, %p1727_p8 }
  0x52   :  { %p1730_p11 = pnand %p1729_p10, %p1723_p7 }
  0x54   :  { %1733 = shalt.err (!%p1730_p11)
}
  0x55   :  { %83 = dma.hbm_to_vmem [thread:$0]  %s1963_s7, 4096, %s78_s24, [#allocation9], %s1766_s21, %s1766_s21, %s1767_s22  }
  0x56   :  { %1756 = dma.done.wait [#allocation3], 128  }
  0x57   :  { %1757 = vsyncadd [#allocation3], 4294967168 }
  0x58   :  { %1758 = dma.done.wait [#allocation6], 3072  }
  0x59   :  { %1759 = vsyncadd [#allocation6], 4294964224 }
  0x5a   :  { %1760 = dma.done.wait [#allocation9], 12288  }
  0x5b   :  { %1761 = vsyncadd [#allocation9], 4294955008  ;;  %v1775_v0 = vmov 0.0   ;;  %vm1776_vm0 = vmmov 0   ;;  %v1463_v1 = vld [vmem:[#allocation5] sm:$0xff]   ;;  %v1464_v2 = vld [vmem:[#allocation5 + $0x8] sm:$0xff]  }
  0x5c   :  { %1428 = vmatprep.subr.bf16.mxu0 %v1775_v0  ;;  %1444 = vmatprep.mubr.msk.bf16.mxu0 %vm1776_vm0, %v1775_v0  ;;  %v1465_v3 = vld [vmem:[#allocation5 + $0x10] sm:$0xff]   ;;  %v1466_v4 = vld [vmem:[#allocation5 + $0x18] sm:$0xff]   ;;  %v1472_v5 = vld [vmem:[#allocation7 + $0x4] ss:$8 sps:$4 sm:$0xff]   ;;  %v1777_v26 = vmov 0   ;;  %s1778_s1 = smov [#allocation11]  }
  0x5d   :  { %1429 = vmatpush3.bf16.msra.mxu0 %v1463_v1  ;;  %v1474_v6 = vld [vmem:[#allocation7] ss:$8 sps:$4 sm:$0xff]   ;;  %333 = vmatprep.subr.bf16.mxu1 %v1472_v5  ;;  %v1475_v7 = vld [vmem:[#allocation7 + $0x14] ss:$8 sps:$4 sm:$0xff]   ;;  %v1477_v8 = vld [vmem:[#allocation7 + $0x10] ss:$8 sps:$4 sm:$0xff]  }
  0x5e   :  { %1430 = vmatprep.subr.bf16.mxu0 %v1775_v0  ;;  %334 = vmatpush1.bf16.msra.mxu1 %v1474_v6  ;;  %v1478_v9 = vld [vmem:[#allocation7 + $0x24] ss:$8 sps:$4 sm:$0xff]   ;;  %v1480_v12 = vld [vmem:[#allocation7 + $0x20] ss:$8 sps:$4 sm:$0xff]   ;;  %v1481_v13 = vld [vmem:[#allocation7 + $0x34] ss:$8 sps:$4 sm:$0xff]  }
  0x5f   :  { %335 = vmatprep.subr.bf16.mxu1 %v1475_v7  ;;  %v1467_v10 = vld [vmem:[#allocation5 + $0x20] sm:$0xff]   ;;  %v1468_v11 = vld [vmem:[#allocation5 + $0x28] sm:$0xff]   ;;  %v1483_v14 = vld [vmem:[#allocation7 + $0x30] ss:$8 sps:$4 sm:$0xff]   ;;  %365 = vmatprep.mubr.bf16.mxu1 %v1777_v26  ;;  %s1238_s10 = sshll.u32 %s1778_s1, 4  ;;  %s1239_s10 = int_to_ptr.vmem [resolvable:$true] %s1238_s10 }
  0x60   :  { %v1484_v15 = vld [vmem:[#allocation7 + $0x44] ss:$8 sps:$4 sm:$0xff]   ;;  %v1469_v16 = vld [vmem:[#allocation5 + $0x30] sm:$0xff]   ;;  %v1486_v17 = vld [vmem:[#allocation7 + $0x40] ss:$8 sps:$4 sm:$0xff]   ;;  %p1739_p13 = scmp.lt.s32.totalorder %s1239_s10, %s1239_s10 }
  0x61   :  { %1431 = vmatpush3.bf16.msra.mxu0 %v1464_v2  ;;  %v1487_v18 = vld [vmem:[#allocation7 + $0x54] ss:$8 sps:$4 sm:$0xff]   ;;  %v1489_v20 = vld [vmem:[#allocation7 + $0x50] ss:$8 sps:$4 sm:$0xff]   ;;  %v1490_v22 = vld [vmem:[#allocation7 + $0x64] ss:$8 sps:$4 sm:$0xff]  }
  0x62   :  { %1432 = vmatprep.subr.bf16.mxu0 %v1775_v0  ;;  %336 = vmatpush1.bf16.msra.mxu1 %v1477_v8  ;;  %v1470_v19 = vld [vmem:[#allocation5 + $0x38] sm:$0xff]   ;;  %v1492_v23 = vld [vmem:[#allocation7 + $0x60] ss:$8 sps:$4 sm:$0xff]   ;;  %v1498_v28 = vld [vmem:[#allocation8 + $0x4] ss:$16 sps:$4 sm:$0xff]  }
  0x63   :  { %337 = vmatprep.subr.bf16.mxu1 %v1478_v9  ;;  %v1471_v21 = vld [vmem:[#allocation2] sm:$0xff]   ;;  %v1496_v27 = vld [vmem:[#allocation8] ss:$16 sps:$4 sm:$0xff]   ;;  %v1504_v30 = vld [vmem:[#allocation8 + $0x24] ss:$16 sps:$4 sm:$0xff]  }
  0x64   :  { %v1493_v24 = vld [vmem:[#allocation7 + $0x74] ss:$8 sps:$4 sm:$0xff]   ;;  %v1495_v25 = vld [vmem:[#allocation7 + $0x70] ss:$8 sps:$4 sm:$0xff]  }
  0x65   :  { %1433 = vmatpush3.bf16.msra.mxu0 %v1465_v3  ;;  %v1501_v29 = vld [vmem:[#allocation8 + $0xc] ss:$16 sps:$4 sm:$0xff]   ;;  %v1502_v31 = vld [vmem:[#allocation8 + $0x20] ss:$16 sps:$4 sm:$0xff]   ;;  %v1510_v32 = vld [vmem:[#allocation8 + $0x44] ss:$16 sps:$4 sm:$0xff]  }
  0x66   :  { %1434 = vmatprep.subr.bf16.mxu0 %v1775_v0  ;;  %338 = vmatpush1.bf16.msra.mxu1 %v1480_v12  ;;  %v1508_v33 = vld [vmem:[#allocation8 + $0x40] ss:$16 sps:$4 sm:$0xff]   ;;  %v1516_v34 = vld [vmem:[#allocation8 + $0x64] ss:$16 sps:$4 sm:$0xff]   ;;  %v1252_v56 = vld [vmem:[%s1958_s2] ss:$0 sm:$0xff] }
  0x67   :  { %339 = vmatprep.subr.bf16.mxu1 %v1481_v13  ;;  %v1514_v35 = vld [vmem:[#allocation8 + $0x60] ss:$16 sps:$4 sm:$0xff]   ;;  %v1522_v36 = vld [vmem:[#allocation8 + $0x84] ss:$16 sps:$4 sm:$0xff]   ;;  %v1499_v1 = vld [vmem:[#allocation8 + $0x8] ss:$16 sps:$4 sm:$0xff]  }
  0x68   :  { %v1520_v37 = vld [vmem:[#allocation8 + $0x80] ss:$16 sps:$4 sm:$0xff]   ;;  %v1528_v38 = vld [vmem:[#allocation8 + $0xa4] ss:$16 sps:$4 sm:$0xff]   ;;  %v1507_v3 = vld [vmem:[#allocation8 + $0x2c] ss:$16 sps:$4 sm:$0xff]  }
  0x69   :  { %1435 = vmatpush3.bf16.msra.mxu0 %v1466_v4  ;;  %v1526_v39 = vld [vmem:[#allocation8 + $0xa0] ss:$16 sps:$4 sm:$0xff]   ;;  %v1534_v40 = vld [vmem:[#allocation8 + $0xc4] ss:$16 sps:$4 sm:$0xff]   ;;  %v1505_v4 = vld [vmem:[#allocation8 + $0x28] ss:$16 sps:$4 sm:$0xff]  }
  0x6a   :  { %1436 = vmatprep.subr.bf16.mxu0 %v1775_v0  ;;  %340 = vmatpush1.bf16.msra.mxu1 %v1483_v14  ;;  %v1532_v41 = vld [vmem:[#allocation8 + $0xc0] ss:$16 sps:$4 sm:$0xff]   ;;  %v1540_v42 = vld [vmem:[#allocation8 + $0xe4] ss:$16 sps:$4 sm:$0xff]   ;;  %v1513_v5 = vld [vmem:[#allocation8 + $0x4c] ss:$16 sps:$4 sm:$0xff]  }
  0x6b   :  { %341 = vmatprep.subr.bf16.mxu1 %v1484_v15  ;;  %v1538_v43 = vld [vmem:[#allocation8 + $0xe0] ss:$16 sps:$4 sm:$0xff]   ;;  %v1546_v44 = vld [vmem:[#allocation8 + $0x104] ss:$16 sps:$4 sm:$0xff]   ;;  %v1511_v6 = vld [vmem:[#allocation8 + $0x48] ss:$16 sps:$4 sm:$0xff]  }
  0x6c   :  { %v1544_v45 = vld [vmem:[#allocation8 + $0x100] ss:$16 sps:$4 sm:$0xff]   ;;  %v1552_v46 = vld [vmem:[#allocation8 + $0x124] ss:$16 sps:$4 sm:$0xff]   ;;  %v1519_v7 = vld [vmem:[#allocation8 + $0x6c] ss:$16 sps:$4 sm:$0xff]  }
  0x6d   :  { %1437 = vmatpush3.bf16.msra.mxu0 %v1467_v10  ;;  %v1550_v47 = vld [vmem:[#allocation8 + $0x120] ss:$16 sps:$4 sm:$0xff]   ;;  %v1558_v48 = vld [vmem:[#allocation8 + $0x144] ss:$16 sps:$4 sm:$0xff]   ;;  %v1517_v8 = vld [vmem:[#allocation8 + $0x68] ss:$16 sps:$4 sm:$0xff]  }
  0x6e   :  { %1438 = vmatprep.subr.bf16.mxu0 %v1775_v0  ;;  %342 = vmatpush1.bf16.msra.mxu1 %v1486_v17  ;;  %v1556_v49 = vld [vmem:[#allocation8 + $0x140] ss:$16 sps:$4 sm:$0xff]   ;;  %v1564_v50 = vld [vmem:[#allocation8 + $0x164] ss:$16 sps:$4 sm:$0xff]   ;;  %v1525_v9 = vld [vmem:[#allocation8 + $0x8c] ss:$16 sps:$4 sm:$0xff]  }
  0x6f   :  { %343 = vmatprep.subr.bf16.mxu1 %v1487_v18  ;;  %v1562_v51 = vld [vmem:[#allocation8 + $0x160] ss:$16 sps:$4 sm:$0xff]   ;;  %v1570_v52 = vld [vmem:[#allocation8 + $0x184] ss:$16 sps:$4 sm:$0xff]   ;;  %v1523_v10 = vld [vmem:[#allocation8 + $0x88] ss:$16 sps:$4 sm:$0xff]  }
  0x70   :  { %v1568_v53 = vld [vmem:[#allocation8 + $0x180] ss:$16 sps:$4 sm:$0xff]   ;;  %v1576_v54 = vld [vmem:[#allocation8 + $0x1a4] ss:$16 sps:$4 sm:$0xff]   ;;  %v1529_v12 = vld [vmem:[#allocation8 + $0xa8] ss:$16 sps:$4 sm:$0xff]  }
  0x71   :  { %1439 = vmatpush3.bf16.msra.mxu0 %v1468_v11  ;;  %v1574_v55 = vld [vmem:[#allocation8 + $0x1a0] ss:$16 sps:$4 sm:$0xff]   ;;  %v1531_v11 = vld [vmem:[#allocation8 + $0xac] ss:$16 sps:$4 sm:$0xff]   ;;  %v1535_v14 = vld [vmem:[#allocation8 + $0xc8] ss:$16 sps:$4 sm:$0xff]  }
  0x72   :  { %1440 = vmatprep.subr.bf16.mxu0 %v1775_v0  ;;  %344 = vmatpush1.bf16.msra.mxu1 %v1489_v20  ;;  %v1537_v13 = vld [vmem:[#allocation8 + $0xcc] ss:$16 sps:$4 sm:$0xff]   ;;  %v1547_v18 = vld [vmem:[#allocation8 + $0x108] ss:$16 sps:$4 sm:$0xff]  }
  0x73   :  { %345 = vmatprep.subr.bf16.mxu1 %v1490_v22  ;;  %v1543_v15 = vld [vmem:[#allocation8 + $0xec] ss:$16 sps:$4 sm:$0xff]   ;;  %v1553_v20 = vld [vmem:[#allocation8 + $0x128] ss:$16 sps:$4 sm:$0xff]  }
  0x74   :  { %v1549_v17 = vld [vmem:[#allocation8 + $0x10c] ss:$16 sps:$4 sm:$0xff]   ;;  %v1559_v22 = vld [vmem:[#allocation8 + $0x148] ss:$16 sps:$4 sm:$0xff]  }
  0x75   :  { %1441 = vmatpush3.bf16.msra.mxu0 %v1469_v16  ;;  %v1541_v16 = vld [vmem:[#allocation8 + $0xe8] ss:$16 sps:$4 sm:$0xff]  }
  0x76   :  { %1442 = vmatprep.subr.bf16.mxu0 %v1775_v0  ;;  %346 = vmatpush1.bf16.msra.mxu1 %v1492_v23  ;;  %v1567_v23 = vld [vmem:[#allocation8 + $0x16c] ss:$16 sps:$4 sm:$0xff]   ;;  %v1571_v26 = vld [vmem:[#allocation8 + $0x188] ss:$16 sps:$4 sm:$0xff]  }
  0x77   :  { %347 = vmatprep.subr.bf16.mxu1 %v1493_v24  ;;  %v1565_v24 = vld [vmem:[#allocation8 + $0x168] ss:$16 sps:$4 sm:$0xff]  }
  0x79   :  { %1443 = vmatpush3.bf16.msra.mxu0 %v1470_v19  ;;  %v1555_v19 = vld [vmem:[#allocation8 + $0x12c] ss:$16 sps:$4 sm:$0xff]  }
  0x7a   :  { %348 = vmatpush1.bf16.msra.mxu1 %v1495_v25  ;;  %788 = vmatprep.subr.bf16.mxu0 %v1498_v28  ;;  %v1573_v25 = vld [vmem:[#allocation8 + $0x18c] ss:$16 sps:$4 sm:$0xff]   ;;  %v1577_v28 = vld [vmem:[#allocation8 + $0x1a8] ss:$16 sps:$4 sm:$0xff]  }
  0x7b   :  { %831 = vmatprep.subr.bf16.mxu1 %v1501_v29  ;;  %v1582_v29 = vld [vmem:[#allocation8 + $0x1c4] ss:$16 sps:$4 sm:$0xff]  }
  0x7c   :  { %1445 = vmatmul.mubr.bf16.vlgmr.msra.gmra.mrb[0].mxu0 %v1471_v21  ;;  %v1561_v21 = vld [vmem:[#allocation8 + $0x14c] ss:$16 sps:$4 sm:$0xff]  }
  0x7d   :  { %789 = vmatpush1.bf16.msra.mxu0 %v1496_v27  ;;  %v1579_v27 = vld [vmem:[#allocation8 + $0x1ac] ss:$16 sps:$4 sm:$0xff]  }
  0x7e   :  { %790 = vmatprep.subr.bf16.mxu0 %v1504_v30  ;;  %v1585_v30 = vld [vmem:[#allocation8 + $0x1cc] ss:$16 sps:$4 sm:$0xff]  }
  0x81   :  { %791 = vmatpush1.bf16.msra.mxu0 %v1502_v31  ;;  %v1580_v31 = vld [vmem:[#allocation8 + $0x1c0] ss:$16 sps:$4 sm:$0xff]  }
  0x82   :  { %792 = vmatprep.subr.bf16.mxu0 %v1510_v32  ;;  %v1583_v32 = vld [vmem:[#allocation8 + $0x1c8] ss:$16 sps:$4 sm:$0xff]  }
  0x85   :  { %793 = vmatpush1.bf16.msra.mxu0 %v1508_v33  ;;  %v1588_v33 = vld [vmem:[#allocation8 + $0x1e4] ss:$16 sps:$4 sm:$0xff]  }
  0x86   :  { %794 = vmatprep.subr.bf16.mxu0 %v1516_v34  ;;  %v1591_v34 = vld [vmem:[#allocation8 + $0x1ec] ss:$16 sps:$4 sm:$0xff]  }
  0x89   :  { %795 = vmatpush1.bf16.msra.mxu0 %v1514_v35  ;;  %v1586_v35 = vld [vmem:[#allocation8 + $0x1e0] ss:$16 sps:$4 sm:$0xff]  }
  0x8a   :  { %796 = vmatprep.subr.bf16.mxu0 %v1522_v36  ;;  %v1589_v36 = vld [vmem:[#allocation8 + $0x1e8] ss:$16 sps:$4 sm:$0xff]  }
  0x8d   :  { %797 = vmatpush1.bf16.msra.mxu0 %v1520_v37  ;;  %v1592_v37 = vld [vmem:[#allocation10 + $0x40] sm:$0xff]  }
  0x8e   :  { %798 = vmatprep.subr.bf16.mxu0 %v1528_v38  ;;  %v1593_v38 = vld [vmem:[#allocation10 + $0xc0] sm:$0xff]  }
  0x91   :  { %799 = vmatpush1.bf16.msra.mxu0 %v1526_v39  ;;  %v243_v39 = vlaneseq }
  0x92   :  { %800 = vmatprep.subr.bf16.mxu0 %v1534_v40 }
  0x93   :  { %v1918_v40 = vshrl.u32 %v243_v39, 7 }
  0x95   :  { %801 = vmatpush1.bf16.msra.mxu0 %v1532_v41  ;;  %v245_v41 = vsub.s32 0, %v1918_v40 }
  0x96   :  { %802 = vmatprep.subr.bf16.mxu0 %v1540_v42  ;;  %v241_v42 = vld [vmem:[%s1960_s4] sm:$0x3] }
  0x99   :  { %803 = vmatpush1.bf16.msra.mxu0 %v1538_v43  ;;  %v249_v43 = vsub.s32 1, %v1918_v40 }
  0x9a   :  { %804 = vmatprep.subr.bf16.mxu0 %v1546_v44  ;;  %v246_v44 = vrot.slane %v241_v42, %v245_v41 }
  0x9d   :  { %805 = vmatpush1.bf16.msra.mxu0 %v1544_v45  ;;  %v250_v45 = vrot.slane %v241_v42, %v249_v43 }
  0x9e   :  { %806 = vmatprep.subr.bf16.mxu0 %v1552_v46 }
  0xa1   :  { %807 = vmatpush1.bf16.msra.mxu0 %v1550_v47 }
  0xa2   :  { %808 = vmatprep.subr.bf16.mxu0 %v1558_v48 }
  0xa5   :  { %809 = vmatpush1.bf16.msra.mxu0 %v1556_v49 }
  0xa6   :  { %810 = vmatprep.subr.bf16.mxu0 %v1564_v50 }
  0xa9   :  { %811 = vmatpush1.bf16.msra.mxu0 %v1562_v51 }
  0xaa   :  { %812 = vmatprep.subr.bf16.mxu0 %v1570_v52 }
  0xad   :  { %813 = vmatpush1.bf16.msra.mxu0 %v1568_v53 }
  0xae   :  { %814 = vmatprep.subr.bf16.mxu0 %v1576_v54 }
  0xb1   :  { %815 = vmatpush1.bf16.msra.mxu0 %v1574_v55 }
  0xb2   :  { %816 = vmatprep.subr.bf16.mxu0 %v1582_v29 }
  0xb5   :  { %817 = vmatpush1.bf16.msra.mxu0 %v1580_v31 }
  0xb6   :  { %818 = vmatprep.subr.bf16.mxu0 %v1588_v33 }
  0xb9   :  { %819 = vmatpush1.bf16.msra.mxu0 %v1586_v35 }
  0xba   :  { %1384 = vmatprep.subr.bf16.mxu0 %v1592_v37 }
 0x14f   :  { %v215_v57 = vpop.f32.mrb[0].mxu0 }
 0x150   :  { %v216_v58 = vadd.f32 %v1252_v56, %v215_v57  ;;  %v1446_v59 = vpop.f32.mrb[1].mxu0 }
 0x151   :  { %v218_v60 = vpop.f32.mrb[2].mxu0 }
 0x152   :  { %v219_v61 = vadd.f32 %v1252_v56, %v218_v60  ;;  %v1447_v62 = vpop.f32.mrb[3].mxu0  ;;  %v222_v63 = vmax.f32 %v216_v58, 0.0  ;;  %v1594_v60 = vld [vmem:[#allocation10] sm:$0xff]  }
 0x153   :  { %v1596_v62 = vld [vmem:[#allocation10 + $0x48] sm:$0xff]  }
 0x154   :  { %v223_v0 = vmax.f32 %v219_v61, 0.0  ;;  %v1595_v61 = vld [vmem:[#allocation10 + $0x80] sm:$0xff]  }
 0x156   :  { %v224_v2 = vpack.c.bf16 %v223_v0, %v222_v63  ;;  %v1597_v63 = vld [vmem:[#allocation10 + $0xc8] sm:$0xff]  }
 0x157   :  { %v1598_v0 = vld [vmem:[#allocation10 + $0x8] sm:$0xff]  }
 0x158   :  { %366 = vmatmul.mubr.bf16.vlgmr.msra.gmra.mrb[0].mxu1 %v224_v2  ;;  %v1600_v2 = vld [vmem:[#allocation10 + $0x50] sm:$0xff]  }
 0x159   :  { %832 = vmatpush1.bf16.msra.mxu1 %v1499_v1  ;;  %v1599_v1 = vld [vmem:[#allocation10 + $0x88] sm:$0xff]  }
 0x15a   :  { %833 = vmatprep.subr.bf16.mxu1 %v1507_v3  ;;  %v1601_v3 = vld [vmem:[#allocation10 + $0xd0] sm:$0xff]  }
 0x15d   :  { %834 = vmatpush1.bf16.msra.mxu1 %v1505_v4  ;;  %v1602_v4 = vld [vmem:[#allocation10 + $0x10] sm:$0xff]  }
 0x15e   :  { %835 = vmatprep.subr.bf16.mxu1 %v1513_v5  ;;  %v1603_v5 = vld [vmem:[#allocation10 + $0x90] sm:$0xff]  }
 0x161   :  { %836 = vmatpush1.bf16.msra.mxu1 %v1511_v6  ;;  %v1604_v6 = vld [vmem:[#allocation10 + $0x58] sm:$0xff]  }
 0x162   :  { %837 = vmatprep.subr.bf16.mxu1 %v1519_v7  ;;  %v1605_v7 = vld [vmem:[#allocation10 + $0xd8] sm:$0xff]  }
 0x165   :  { %838 = vmatpush1.bf16.msra.mxu1 %v1517_v8  ;;  %v1606_v8 = vld [vmem:[#allocation10 + $0x18] sm:$0xff]  }
 0x166   :  { %839 = vmatprep.subr.bf16.mxu1 %v1525_v9  ;;  %v1607_v9 = vld [vmem:[#allocation10 + $0x98] sm:$0xff]  }
 0x169   :  { %840 = vmatpush1.bf16.msra.mxu1 %v1523_v10  ;;  %v1608_v10 = vld [vmem:[#allocation10 + $0x60] sm:$0xff]  }
 0x16a   :  { %841 = vmatprep.subr.bf16.mxu1 %v1531_v11  ;;  %v1609_v11 = vld [vmem:[#allocation10 + $0xe0] sm:$0xff]  }
 0x16d   :  { %842 = vmatpush1.bf16.msra.mxu1 %v1529_v12  ;;  %v1610_v12 = vld [vmem:[#allocation10 + $0x20] sm:$0xff]  }
 0x16e   :  { %843 = vmatprep.subr.bf16.mxu1 %v1537_v13  ;;  %v1611_v13 = vld [vmem:[#allocation10 + $0xa0] sm:$0xff]  }
 0x171   :  { %844 = vmatpush1.bf16.msra.mxu1 %v1535_v14  ;;  %v1612_v14 = vld [vmem:[#allocation10 + $0x68] sm:$0xff]  }
 0x172   :  { %845 = vmatprep.subr.bf16.mxu1 %v1543_v15  ;;  %v1613_v15 = vld [vmem:[#allocation10 + $0xe8] sm:$0xff]  }
 0x175   :  { %846 = vmatpush1.bf16.msra.mxu1 %v1541_v16  ;;  %v1614_v16 = vld [vmem:[#allocation10 + $0x28] sm:$0xff]  }
 0x176   :  { %847 = vmatprep.subr.bf16.mxu1 %v1549_v17  ;;  %v1615_v17 = vld [vmem:[#allocation10 + $0xa8] sm:$0xff]  }
 0x179   :  { %848 = vmatpush1.bf16.msra.mxu1 %v1547_v18  ;;  %v1616_v18 = vld [vmem:[#allocation10 + $0x70] sm:$0xff]  }
 0x17a   :  { %849 = vmatprep.subr.bf16.mxu1 %v1555_v19  ;;  %v1617_v19 = vld [vmem:[#allocation10 + $0xf0] sm:$0xff]  }
 0x17d   :  { %850 = vmatpush1.bf16.msra.mxu1 %v1553_v20  ;;  %v1618_v20 = vld [vmem:[#allocation10 + $0x30] sm:$0xff]  }
 0x17e   :  { %851 = vmatprep.subr.bf16.mxu1 %v1561_v21  ;;  %v1619_v21 = vld [vmem:[#allocation10 + $0xb0] sm:$0xff]  }
 0x181   :  { %852 = vmatpush1.bf16.msra.mxu1 %v1559_v22  ;;  %v1620_v22 = vld [vmem:[#allocation10 + $0x78] sm:$0xff]  }
 0x182   :  { %853 = vmatprep.subr.bf16.mxu1 %v1567_v23  ;;  %v1621_v23 = vld [vmem:[#allocation10 + $0xf8] sm:$0xff]  }
 0x185   :  { %854 = vmatpush1.bf16.msra.mxu1 %v1565_v24  ;;  %v1622_v24 = vld [vmem:[#allocation10 + $0x38] sm:$0xff]  }
 0x186   :  { %855 = vmatprep.subr.bf16.mxu1 %v1573_v25  ;;  %v1623_v25 = vld [vmem:[#allocation10 + $0xb8] sm:$0xff]  }
 0x189   :  { %856 = vmatpush1.bf16.msra.mxu1 %v1571_v26  ;;  %v458_v26 = vsub.s32 2, %v1918_v40 }
 0x18a   :  { %857 = vmatprep.subr.bf16.mxu1 %v1579_v27  ;;  %v446_v27 = vld [vmem:[%s1962_s6] sm:$0xf] }
 0x18b   :  { %v451_v29 = vrot.slane %v446_v27, %v245_v41  ;;  %v455_v31 = vrot.slane %v446_v27, %v249_v43 }
 0x18d   :  { %858 = vmatpush1.bf16.msra.mxu1 %v1577_v28  ;;  %v462_v28 = vsub.s32 3, %v1918_v40 }
 0x18e   :  { %859 = vmatprep.subr.bf16.mxu1 %v1585_v30  ;;  %v459_v30 = vrot.slane %v446_v27, %v458_v26 }
 0x191   :  { %860 = vmatpush1.bf16.msra.mxu1 %v1583_v32  ;;  %v463_v32 = vrot.slane %v446_v27, %v462_v28 }
 0x192   :  { %861 = vmatprep.subr.bf16.mxu1 %v1591_v34 }
 0x195   :  { %862 = vmatpush1.bf16.msra.mxu1 %v1589_v36 }
 0x196   :  { %1406 = vmatprep.subr.bf16.mxu1 %v1593_v38 }
 0x22b   :  { %v367_v46 = vpop.f32.mrb[0].mxu1 }
 0x22c   :  { %v368_v47 = vadd.f32 %v367_v46, %v246_v44  ;;  %v369_v48 = vpop.f32.mrb[1].mxu1 }
 0x22d   :  { %v370_v49 = vadd.f32 %v369_v48, %v250_v45  ;;  %v371_v50 = vpop.f32.mrb[2].mxu1 }
 0x22e   :  { %v372_v51 = vadd.f32 %v371_v50, %v246_v44  ;;  %v373_v52 = vpop.f32.mrb[3].mxu1  ;;  %v376_v54 = vmax.f32 %v368_v47, 0.0 }
 0x22f   :  { %v374_v53 = vadd.f32 %v373_v52, %v250_v45  ;;  %v377_v56 = vmax.f32 %v370_v49, 0.0 }
 0x230   :  { %v378_v55 = vmax.f32 %v372_v51, 0.0 }
 0x231   :  { %v379_v57 = vmax.f32 %v374_v53, 0.0 }
 0x232   :  { %v380_v58 = vpack.c.bf16 %v378_v55, %v376_v54 }
 0x233   :  { %v381_v59 = vpack.c.bf16 %v379_v57, %v377_v56 }
 0x235   :  { %820 = vmatprep.mubr.bf16.mxu0 %v381_v59  ;;  %863 = vmatprep.mubr.bf16.mxu1 %v381_v59 }
 0x236   :  { %821 = vmatmul.mubr.bf16.vlgmr.msra.gmra.mrb[4].mxu0 %v380_v58  ;;  %864 = vmatmul.mubr.bf16.vlgmr.msra.gmra.mrb[4].mxu1 %v380_v58 }
 0x237   :  { %1385 = vmatpush3.bf16.msra.mxu0 %v1594_v60  ;;  %1407 = vmatpush3.bf16.msra.mxu1 %v1595_v61 }
 0x238   :  { %1386 = vmatprep.subr.bf16.mxu0 %v1596_v62  ;;  %1408 = vmatprep.subr.bf16.mxu1 %v1597_v63  ;;  %v1342_v63 = vld [vmem:[%s1964_s8] ss:$0 sm:$0xff]  ;;  %s1734_s8 = scalar_lea.vmem %s1239_s10, 256 }
 0x239   :  { %p1735_p12 = scmp.ne.s32.totalorder %s1239_s10, %s1734_s8  ;;  %p1740_p0 = scmp.lt.s32.totalorder %s1734_s8, %s1734_s8 }
 0x23b   :  { %1387 = vmatpush3.bf16.msra.mxu0 %v1598_v0  ;;  %1409 = vmatpush3.bf16.msra.mxu1 %v1599_v1  ;;  %p1741_p1 = por %p1740_p0, %p1739_p13 }
 0x23c   :  { %1388 = vmatprep.subr.bf16.mxu0 %v1600_v2  ;;  %1410 = vmatprep.subr.bf16.mxu1 %v1601_v3 }
 0x23d   :  { %p1742_p2 = pnand %p1741_p1, %p1735_p12 }
 0x23f   :  { %1389 = vmatpush3.bf16.msra.mxu0 %v1602_v4  ;;  %1411 = vmatpush3.bf16.msra.mxu1 %v1603_v5 }
 0x240   :  { %1390 = vmatprep.subr.bf16.mxu0 %v1604_v6  ;;  %1412 = vmatprep.subr.bf16.mxu1 %v1605_v7 }
 0x243   :  { %1391 = vmatpush3.bf16.msra.mxu0 %v1606_v8  ;;  %1413 = vmatpush3.bf16.msra.mxu1 %v1607_v9 }
 0x244   :  { %1392 = vmatprep.subr.bf16.mxu0 %v1608_v10  ;;  %1414 = vmatprep.subr.bf16.mxu1 %v1609_v11 }
 0x247   :  { %1393 = vmatpush3.bf16.msra.mxu0 %v1610_v12  ;;  %1415 = vmatpush3.bf16.msra.mxu1 %v1611_v13 }
 0x248   :  { %1394 = vmatprep.subr.bf16.mxu0 %v1612_v14  ;;  %1416 = vmatprep.subr.bf16.mxu1 %v1613_v15 }
 0x24b   :  { %1395 = vmatpush3.bf16.msra.mxu0 %v1614_v16  ;;  %1417 = vmatpush3.bf16.msra.mxu1 %v1615_v17 }
 0x24c   :  { %1396 = vmatprep.subr.bf16.mxu0 %v1616_v18  ;;  %1418 = vmatprep.subr.bf16.mxu1 %v1617_v19 }
 0x24f   :  { %1397 = vmatpush3.bf16.msra.mxu0 %v1618_v20  ;;  %1419 = vmatpush3.bf16.msra.mxu1 %v1619_v21 }
 0x250   :  { %1398 = vmatprep.subr.bf16.mxu0 %v1620_v22  ;;  %1420 = vmatprep.subr.bf16.mxu1 %v1621_v23 }
 0x253   :  { %1399 = vmatpush3.bf16.msra.mxu0 %v1622_v24  ;;  %1421 = vmatpush3.bf16.msra.mxu1 %v1623_v25 }
 0x309   :  { %v822_v33 = vpop.f32.mrb[4].mxu0  ;;  %v865_v34 = vpop.f32.mrb[4].mxu1 }
 0x30a   :  { %v823_v35 = vadd.f32 %v822_v33, %v451_v29  ;;  %v866_v36 = vadd.f32 %v865_v34, %v459_v30  ;;  %v824_v37 = vpop.f32.mrb[5].mxu0  ;;  %v867_v38 = vpop.f32.mrb[5].mxu1 }
 0x30b   :  { %v825_v39 = vadd.f32 %v824_v37, %v455_v31  ;;  %v868_v42 = vadd.f32 %v867_v38, %v463_v32  ;;  %v826_v44 = vpop.f32.mrb[6].mxu0  ;;  %v869_v45 = vpop.f32.mrb[6].mxu1 }
 0x30c   :  { %v827_v46 = vadd.f32 %v826_v44, %v451_v29  ;;  %v870_v47 = vadd.f32 %v869_v45, %v459_v30  ;;  %v828_v48 = vpop.f32.mrb[7].mxu0  ;;  %v871_v49 = vpop.f32.mrb[7].mxu1  ;;  %v874_v51 = vmax.f32 %v823_v35, 0.0  ;;  %v876_v40 = vmax.f32 %v866_v36, 0.0 }
 0x30d   :  { %v829_v41 = vadd.f32 %v828_v48, %v455_v31  ;;  %v872_v50 = vadd.f32 %v871_v49, %v463_v32  ;;  %v875_v53 = vmax.f32 %v825_v39, 0.0  ;;  %v877_v54 = vmax.f32 %v868_v42, 0.0 }
 0x30e   :  { %v878_v43 = vmax.f32 %v827_v46, 0.0  ;;  %v880_v52 = vmax.f32 %v870_v47, 0.0 }
 0x30f   :  { %v879_v55 = vmax.f32 %v829_v41, 0.0  ;;  %v881_v56 = vmax.f32 %v872_v50, 0.0 }
 0x310   :  { %v882_v57 = vpack.c.bf16 %v878_v43, %v874_v51  ;;  %v884_v58 = vpack.c.bf16 %v880_v52, %v876_v40 }
 0x311   :  { %v883_v59 = vpack.c.bf16 %v879_v55, %v875_v53  ;;  %v885_v60 = vpack.c.bf16 %v881_v56, %v877_v54 }
 0x313   :  { %1181 = vmatprep.mubr.bf16.mxu0 %v883_v59  ;;  %1222 = vmatprep.mubr.bf16.mxu1 %v885_v60 }
 0x314   :  { %1182 = vmatmul.mubr.bf16.vlgmr.msra.gmra.mrb[8].mxu0 %v882_v57  ;;  %1223 = vmatmul.mubr.bf16.vlgmr.msra.gmra.mrb[8].mxu1 %v884_v58 }
 0x3e7   :  { %v1400_v61 = vpop.f32.mrb[8].mxu0  ;;  %v1422_v62 = vpop.f32.mrb[8].mxu1 }
 0x3e8   :  { %v1401_v0 = vpop.f32.mrb[9].mxu0  ;;  %v1423_v1 = vpop.f32.mrb[9].mxu1 }
 0x3e9   :  { %v1402_v2 = vadd.f32 %v1401_v0, %v1400_v61  ;;  %v1424_v3 = vadd.f32 %v1423_v1, %v1422_v62  ;;  %v1403_v4 = vpop.f32.mrb[10].mxu0  ;;  %v1425_v5 = vpop.f32.mrb[10].mxu1 }
 0x3ea   :  { %v1404_v6 = vpop.f32.mrb[11].mxu0  ;;  %v1426_v7 = vpop.f32.mrb[11].mxu1 }
 0x3eb   :  { %v1184_v8 = vadd.f32 %v1402_v2, %v1342_v63  ;;  %v1405_v9 = vadd.f32 %v1404_v6, %v1403_v4  ;;  %v1427_v10 = vadd.f32 %v1426_v7, %v1425_v5 }
 0x3ed   :  { %v1225_v11 = vadd.f32 %v1424_v3, %v1184_v8  ;;  %v1187_v12 = vadd.f32 %v1405_v9, %v1342_v63 }
 0x3ef   :  { %1231 = vst [vmem:[#allocation11] sm:$0xff] %v1225_v11  ;;  %v1228_v13 = vadd.f32 %v1427_v10, %v1187_v12 }
 0x3f1   :  { %1232 = vst [vmem:[#allocation11 + $0x8] sm:$0xff] %v1228_v13 }
 0x3f2   :  { %1745 = shalt.err (!%p1742_p2)
}
 0x3f3   :  { %s1746_s16 = scalar_lea.hbm %s1965_s9, 256 }
 0x3f4   :  { %p1747_p3 = scmp.ne.s32.totalorder %s1965_s9, %s1746_s16  ;;  %p1750_p4 = scmp.lt.u32.totalorder %s1746_s16, %s1965_s9 }
 0x3f6   :  { %p1752_p5 = pnand %p1750_p4, %p1747_p3 }
 0x3f8   :  { %1755 = shalt.err (!%p1752_p5)
}
 0x3f9   :  { %1244 = dma.vmem_to_hbm [thread:$0]  %s1239_s10, 256, %s1965_s9, [#allocation4], %s1772_s0, %s1772_s0, %s1773_s17  }
 0x3fa   :  { %1762 = dma.done.wait [#allocation4], 256  }
 0x3fb   :  { %1763 = vsyncadd [#allocation4], 4294967040 }
 0x3fc   :  { %1248 = vsyncpa [#allocation3], 1 }
 0x3fd   :  { %1249 = vsyncpa [#allocation6], 1 }
 0x3fe   :  { %1250 = vsyncpa [#allocation9], 1 }
 0x3ff   :  { %1251 = vsyncpa [#allocation4], 1 }

</bundles_post_ra>
